<compile_context>
chip_gen: v6e
topology: v6e:2x2x1
jax: 0.10.0
libtpu: 0.0.40
codegen_flags: <defaults>
</compile_context>

<pallas_src>
import functools

import jax
import jax.numpy as jnp
from jax import lax
from jax.experimental import pallas as pl
from jax.experimental.pallas import tpu as pltpu


# ----------------------------------------------------------------------------
# Kernel 1: batched input projection  GI = X @ W_all
# One big MXU matmul for the whole sequence, both directions, all 3 gates.
# Column layout of the 6H axis: [r_f | r_b | z_f | z_b | n_f | n_b].
# ----------------------------------------------------------------------------
def _input_proj_kernel(x_ref, w_ref, o_ref):
    o_ref[...] = jnp.dot(x_ref[...].astype(jnp.bfloat16), w_ref[...],
                         preferred_element_type=jnp.float32)


def input_projection(x_flat, w_all_bf16):
    n, _ = x_flat.shape
    g = w_all_bf16.shape[1]
    # Toy-sized: whole problem fits a single VMEM block; tile over rows at
    # real scale (see linear_and_ce for the tiled pattern).
    return pl.pallas_call(
        _input_proj_kernel,
        out_shape=jax.ShapeDtypeStruct((n, g), jnp.float32),
    )(x_flat, w_all_bf16)


# ----------------------------------------------------------------------------
# Kernel 2: fused bidirectional GRU recurrence for one layer.
#   - hidden state (B, 2H) = [h_fwd | h_bwd] in VMEM scratch
#   - one block-diagonal (2H, 6H) hidden-weight matmul per step
#   - time loop inside the kernel; GI (T, B, 6H) and outputs VMEM resident
# PyTorch GRU (bias=False):
#   r = sigmoid(gi_r + gh_r); z = sigmoid(gi_z + gh_z)
#   n = tanh(gi_n + r * gh_n); h' = (1 - z) * n + z * h
# ----------------------------------------------------------------------------
def _bigru_layer_kernel(gi_ref, wh_ref, of_ref, ob_ref, h_scr):
    T, B, G = gi_ref.shape           # G = 6H
    H = G // 6
    H2 = 2 * H

    h_scr[...] = jnp.zeros_like(h_scr)

    # Column selector (hoisted): within each 2H gate block, first H columns
    # belong to the forward direction, last H to the backward direction.
    lane = lax.broadcasted_iota(jnp.int32, (B, G), 1)
    fwd_col = (lane % H2) < H
    wh = wh_ref[...]                 # (2H, 6H) bf16, resident for the loop

    def step(s, carry):
        h = h_scr[...]                                         # (B, 2H) f32
        gh = jnp.dot(h.astype(jnp.bfloat16), wh,
                     preferred_element_type=jnp.float32)       # (B, 6H)
        # Forward direction consumes x[s], backward consumes x[T-1-s].
        gi = jnp.where(fwd_col, gi_ref[s], gi_ref[T - 1 - s])  # (B, 6H)
        r = jax.nn.sigmoid(gi[:, 0:H2] + gh[:, 0:H2])
        z = jax.nn.sigmoid(gi[:, H2:2 * H2] + gh[:, H2:2 * H2])
        n = jnp.tanh(gi[:, 2 * H2:3 * H2] + r * gh[:, 2 * H2:3 * H2])
        h_new = (1.0 - z) * n + z * h                          # (B, 2H)
        h_scr[...] = h_new
        of_ref[s] = h_new[:, 0:H]                  # forward output at time s
        ob_ref[T - 1 - s] = h_new[:, H:H2]         # backward output, fwd order
        return carry

    lax.fori_loop(0, T, step, 0)


def bigru_layer(gi, wh_blk_bf16):
    T, B, G = gi.shape
    H = G // 6
    return pl.pallas_call(
        _bigru_layer_kernel,
        out_shape=(jax.ShapeDtypeStruct((T, B, H), jnp.float32),
                   jax.ShapeDtypeStruct((T, B, H), jnp.float32)),
        scratch_shapes=[pltpu.VMEM((B, 2 * H), jnp.float32)],
    )(gi, wh_blk_bf16)


# ----------------------------------------------------------------------------
# Kernel 3: output projection + mean cross-entropy, tiled over rows.
#   logits = feats @ W_out^T + b            (rows tiled; V padded to 128)
#   loss   = sum_i mask_i * (logsumexp(logits_i) - logits_i[target_i]) / N
# Loss is accumulated in a VMEM scratch across grid steps (pl.when init /
# finalize); padded vocab columns carry a -1e30 bias so they never win the
# max and contribute 0 to the softmax sum.
# ----------------------------------------------------------------------------
def _linear_ce_kernel(feats_ref, wt_ref, b_ref, tgt_ref, msk_ref,
                      logits_ref, loss_ref, acc_scr, *, n_rows):
    i = pl.program_id(0)

    @pl.when(i == 0)
    def _():
        acc_scr[...] = jnp.zeros_like(acc_scr)

    logits = jnp.dot(feats_ref[...].astype(jnp.bfloat16), wt_ref[...],
                     preferred_element_type=jnp.float32) + b_ref[...]
    logits_ref[...] = logits

    m = jnp.max(logits, axis=-1, keepdims=True)
    lse = m + jnp.log(jnp.sum(jnp.exp(logits - m), axis=-1, keepdims=True))
    col = lax.broadcasted_iota(jnp.int32, logits.shape, 1)
    onehot = col == tgt_ref[...]                       # (tn, V_pad)
    tgt_logit = jnp.sum(jnp.where(onehot, logits, 0.0), axis=-1, keepdims=True)
    acc_scr[...] = acc_scr[...] + jnp.sum((lse - tgt_logit) * msk_ref[...])

    @pl.when(i == pl.num_programs(0) - 1)
    def _():
        loss_ref[...] = acc_scr[...] / n_rows


def linear_and_ce(feats, w_out_t_pad_bf16, b_out_pad, targets, n_valid):
    n, f = feats.shape
    v_pad = w_out_t_pad_bf16.shape[1]
    tn = 128 if n >= 128 else 8
    n_pad = pl.cdiv(n, tn) * tn

    feats_p = jnp.zeros((n_pad, f), feats.dtype).at[:n].set(feats)
    tgt_p = jnp.zeros((n_pad, 1), jnp.int32).at[:n, 0].set(targets)
    msk_p = jnp.zeros((n_pad, 1), jnp.float32).at[:n, 0].set(1.0)

    kernel = functools.partial(_linear_ce_kernel, n_rows=float(n_valid))
    logits_pad, loss = pl.pallas_call(
        kernel,
        out_shape=(jax.ShapeDtypeStruct((n_pad, v_pad), jnp.float32),
                   jax.ShapeDtypeStruct((1, 1), jnp.float32)),
        grid=(n_pad // tn,),
        in_specs=[
            pl.BlockSpec((tn, f), lambda i: (i, 0)),
            pl.BlockSpec((f, v_pad), lambda i: (0, 0)),
            pl.BlockSpec((1, v_pad), lambda i: (0, 0)),
            pl.BlockSpec((tn, 1), lambda i: (i, 0)),
            pl.BlockSpec((tn, 1), lambda i: (i, 0)),
        ],
        out_specs=(pl.BlockSpec((tn, v_pad), lambda i: (i, 0)),
                   pl.BlockSpec((1, 1), lambda i: (0, 0))),
        scratch_shapes=[pltpu.VMEM((1, 1), jnp.float32)],
        compiler_params=pltpu.CompilerParams(
            dimension_semantics=("arbitrary",)),
    )(feats_p, w_out_t_pad_bf16, b_out_pad.reshape(1, v_pad), tgt_p, msk_p)
    return logits_pad, loss[0, 0]


# ----------------------------------------------------------------------------
# Full forward (GRU path of BIDIRECTIONAL_RNN.forward_GRU)
# ----------------------------------------------------------------------------
def bidirectional_rnn_gru_forward(inputs, params, n_layers, hid_dim, vocab_out):
    x = params["embed"][inputs]                      # (T, B, E) gather (glue)
    T, B, _ = x.shape
    H = hid_dim

    layer_in = x
    for layer in range(n_layers):
        w_i_all, w_h_blk = params["fused"][layer]
        in_size = layer_in.shape[-1]
        gi = input_projection(layer_in.reshape(T * B, in_size), w_i_all)
        gi = gi.reshape(T, B, 6 * H)
        out_f, out_b = bigru_layer(gi, w_h_blk)
        layer_in = jnp.concatenate([out_f, out_b], axis=-1)   # (T, B, 2H)

    feats = layer_in.reshape(T * B, 2 * H)
    targets = inputs.reshape(-1).astype(jnp.int32)
    logits_pad, loss = linear_and_ce(
        feats, params["w_out_t_pad"], params["b_out_pad"], targets,
        n_valid=T * B)
    logits = logits_pad[:T * B, :vocab_out].reshape(T, B, vocab_out)
    return logits, loss


# ----------------------------------------------------------------------------
# Parameter construction (shapes follow nn.Module __init__) + TPU-friendly
# fused layouts (gate-interleaved input weights, block-diag hidden weights).
# ----------------------------------------------------------------------------
def init_params(key, vocab_out, embed_dim, hid_dim, n_layers, pad_idx):
    keys = iter(jax.random.split(key, 4 + n_layers * 2 * 6))
    params = {}

    embed = 0.1 * jax.random.normal(next(keys), (vocab_out, embed_dim),
                                    dtype=jnp.float32)
    params["embed"] = embed.at[pad_idx].set(0.0)     # padding_idx row is zero

    gru_layers = []
    for layer in range(n_layers):
        in_size = embed_dim if layer == 0 else 2 * hid_dim
        dirs = []
        for _d in range(2):
            def mk(shape):
                return 0.1 * jax.random.normal(next(keys), shape,
                                               dtype=jnp.float32)
            dirs.append({
                "w_ir_t": mk((in_size, hid_dim)),
                "w_iz_t": mk((in_size, hid_dim)),
                "w_in_t": mk((in_size, hid_dim)),
                "w_hr_t": mk((hid_dim, hid_dim)),
                "w_hz_t": mk((hid_dim, hid_dim)),
                "w_hn_t": mk((hid_dim, hid_dim)),
            })
        gru_layers.append(dirs)
    params["gru"] = gru_layers

    params["w_out_t"] = 0.1 * jax.random.normal(
        next(keys), (2 * hid_dim, vocab_out), dtype=jnp.float32)
    params["b_out"] = 0.1 * jax.random.normal(
        next(keys), (vocab_out,), dtype=jnp.float32)
    return params


def _fuse_layer_weights(dir_params, in_size, hid):
    """(in_size, 6H) input weight and (2H, 6H) block-diag hidden weight.
    Column layout of the 6H axis: [r_f | r_b | z_f | z_b | n_f | n_b]."""
    H = hid
    w_i = jnp.zeros((in_size, 6 * H), jnp.float32)
    w_h = jnp.zeros((2 * H, 6 * H), jnp.float32)
    gate_i = ("w_ir_t", "w_iz_t", "w_in_t")
    gate_h = ("w_hr_t", "w_hz_t", "w_hn_t")
    for g in range(3):
        for d in range(2):
            c0 = g * 2 * H + d * H
            w_i = w_i.at[:, c0:c0 + H].set(dir_params[d][gate_i[g]])
            w_h = w_h.at[d * H:(d + 1) * H, c0:c0 + H].set(
                dir_params[d][gate_h[g]])
    return w_i.astype(jnp.bfloat16), w_h.astype(jnp.bfloat16)


def prepare_fused_params(raw, n_layers, hid_dim):
    embed_dim = raw["embed"].shape[1]
    fused = []
    for layer in range(n_layers):
        in_size = embed_dim if layer == 0 else 2 * hid_dim
        fused.append(_fuse_layer_weights(raw["gru"][layer], in_size, hid_dim))

    V = raw["w_out_t"].shape[1]
    v_pad = ((V + 127) // 128) * 128                 # lane-dense logits
    w_out_pad = jnp.zeros((2 * hid_dim, v_pad), jnp.float32)
    w_out_pad = w_out_pad.at[:, :V].set(raw["w_out_t"]).astype(jnp.bfloat16)
    b_out_pad = jnp.full((v_pad,), -1e30, jnp.float32).at[:V].set(raw["b_out"])

    return {"embed": raw["embed"], "fused": fused,
            "w_out_t_pad": w_out_pad, "b_out_pad": b_out_pad}


if __name__ == "__main__":
    # Small, module-consistent config.
    vocab = {"<pad>": 0, "the": 1, "cat": 2, "sat": 3, "on": 4,
             "mat": 5, "dog": 6, "ran": 7, "far": 8, "away": 9}
    embed_dim = 16
    hid_dim = 32
    n_layers = 2
    seq_len = 8
    batch = 2
    input_dim = len(vocab)
    vocab_out = input_dim + 2        # matches nn.Embedding(input_dim + 2, ...)

    key = jax.random.PRNGKey(0)
    k_par, k_inp = jax.random.split(key)
    raw = init_params(k_par, vocab_out, embed_dim, hid_dim, n_layers,
                      pad_idx=vocab["<pad>"])
    params = prepare_fused_params(raw, n_layers, hid_dim)

    # (T, B) time-major token ids, as fed to self.embed(inputs) in forward_GRU.
    inputs = jax.random.randint(k_inp, (seq_len, batch), 0, vocab_out,
                                dtype=jnp.int32)

    fwd = jax.jit(functools.partial(bidirectional_rnn_gru_forward,
                                    n_layers=n_layers, hid_dim=hid_dim,
                                    vocab_out=vocab_out))
    logits, loss = fwd(inputs, params)
    jax.block_until_ready((logits, loss))

    assert logits.shape == (seq_len, batch, vocab_out)
    assert loss.shape == ()
    assert bool(jnp.isfinite(loss))
    # TODO(synk): sample_GRU / sample_LSTM (Categorical sampling Python loop)
    # and the forward_LSTM path are not implemented (not kernel hot paths).
    print("KERNEL_OK")
</pallas_src>

<mosaic_0001>
module attributes {stable_mosaic.version = 11 : i64} {
  func.func @_input_proj_kernel(%arg0: memref<16x16xf32, #tpu.memory_space<vmem>>, %arg1: memref<16x192xbf16, #tpu.memory_space<vmem>>, %arg2: memref<16x192xf32, #tpu.memory_space<vmem>>) attributes {dimension_semantics = [], scalar_prefetch = 0 : i64, scratch_operands = 0 : i64, tpu.core_type = #tpu.core_type<tc>} {
    %c0 = arith.constant 0 : index
    %c0_0 = arith.constant 0 : index
    %0 = vector.load %arg0[%c0, %c0_0] : memref<16x16xf32, #tpu.memory_space<vmem>>, vector<16x16xf32>
    %1 = arith.truncf %0 : vector<16x16xf32> to vector<16x16xbf16>
    %c0_1 = arith.constant 0 : index
    %c0_2 = arith.constant 0 : index
    %2 = vector.load %arg1[%c0_1, %c0_2] : memref<16x192xbf16, #tpu.memory_space<vmem>>, vector<16x192xbf16>
    %cst = arith.constant dense<0.000000e+00> : vector<16x192xf32>
    %3 = tpu.matmul %1, %2, %cst {dimension_numbers = #tpu.dot_dimension_numbers<[1], [0], [0], [1], [0, 0, 1, 1], [], []>} : vector<16x16xbf16>, vector<16x192xbf16>, vector<16x192xf32> -> vector<16x192xf32>
    %c0_3 = arith.constant 0 : index
    %c0_4 = arith.constant 0 : index
    %4 = vector.load %arg2[%c0_3, %c0_4] : memref<16x192xf32, #tpu.memory_space<vmem>>, vector<16x192xf32>
    tpu.vector_store %arg2[%c0_3, %c0_4], %3 {strides = array<i32>} : memref<16x192xf32, #tpu.memory_space<vmem>>, vector<16x192xf32>,
    return
  }
}

module attributes {stable_mosaic.version = 11 : i64} {
  func.func @_bigru_layer_kernel(%arg0: memref<8x2x192xf32, #tpu.memory_space<vmem>>, %arg1: memref<64x192xbf16, #tpu.memory_space<vmem>>, %arg2: memref<8x2x32xf32, #tpu.memory_space<vmem>>, %arg3: memref<8x2x32xf32, #tpu.memory_space<vmem>>, %arg4: memref<2x64xf32, #tpu.memory_space<vmem>>) attributes {dimension_semantics = [], scalar_prefetch = 0 : i64, scratch_operands = 1 : i64, tpu.core_type = #tpu.core_type<tc>} {
    %cst = arith.constant 0.000000e+00 : f32
    %0 = vector.broadcast %cst : f32 to vector<2x64xf32>
    %c0 = arith.constant 0 : index
    %c0_0 = arith.constant 0 : index
    %1 = vector.load %arg4[%c0, %c0_0] : memref<2x64xf32, #tpu.memory_space<vmem>>, vector<2x64xf32>
    tpu.vector_store %arg4[%c0, %c0_0], %0 {strides = array<i32>} : memref<2x64xf32, #tpu.memory_space<vmem>>, vector<2x64xf32>,
    %2 = tpu.iota {dimensions = array<i32: 1>} : vector<2x192xi32>
    %c64_i32 = arith.constant 64 : i32
    %c0_i32 = arith.constant 0 : i32
    %3 = arith.cmpi eq, %c64_i32, %c0_i32 : i32
    %c1_i32 = arith.constant 1 : i32
    %4 = arith.select %3, %c1_i32, %c64_i32 : i32
    %5 = vector.broadcast %4 : i32 to vector<2x192xi32>
    %6 = arith.remsi %2, %5 : vector<2x192xi32>
    %c0_i32_1 = arith.constant 0 : i32
    %7 = vector.broadcast %c0_i32_1 : i32 to vector<2x192xi32>
    %8 = arith.cmpi ne, %6, %7 : vector<2x192xi32>
    %c0_i32_2 = arith.constant 0 : i32
    %9 = vector.broadcast %c0_i32_2 : i32 to vector<2x192xi32>
    %10 = arith.cmpi slt, %6, %9 : vector<2x192xi32>
    %c0_i32_3 = arith.constant 0 : i32
    %11 = arith.cmpi slt, %4, %c0_i32_3 : i32
    %12 = vector.broadcast %11 : i1 to vector<2x192xi1>
    %13 = vector.broadcast %12 : vector<2x192xi1> to vector<2x192xi1>
    %14 = arith.xori %10, %13 : vector<2x192xi1>
    %15 = arith.andi %14, %8 : vector<2x192xi1>
    %16 = vector.broadcast %4 : i32 to vector<2x192xi32>
    %17 = arith.addi %6, %16 : vector<2x192xi32>
    %18 = arith.select %15, %17, %6 : vector<2x192xi1>, vector<2x192xi32>
    %c32_i32 = arith.constant 32 : i32
    %19 = vector.broadcast %c32_i32 : i32 to vector<2x192xi32>
    %20 = arith.cmpi slt, %18, %19 : vector<2x192xi32>
    %c0_4 = arith.constant 0 : index
    %c0_5 = arith.constant 0 : index
    %21 = vector.load %arg1[%c0_4, %c0_5] : memref<64x192xbf16, #tpu.memory_space<vmem>>, vector<64x192xbf16>
    %c0_i32_6 = arith.constant 0 : i32
    %c8_i32 = arith.constant 8 : i32
    %22 = arith.addi %c0_i32_6, %c8_i32 : i32
    %c1_i32_7 = arith.constant 1 : i32
    scf.for %arg5 = %c0_i32_6 to %22 step %c1_i32_7  : i32 {
      %c0_9 = arith.constant 0 : index
      %c0_10 = arith.constant 0 : index
      %23 = vector.load %arg4[%c0_9, %c0_10] : memref<2x64xf32, #tpu.memory_space<vmem>>, vector<2x64xf32>
      %24 = arith.truncf %23 : vector<2x64xf32> to vector<2x64xbf16>
      %cst_11 = arith.constant dense<0.000000e+00> : vector<2x192xf32>
      %25 = tpu.matmul %24, %21, %cst_11 {dimension_numbers = #tpu.dot_dimension_numbers<[1], [0], [0], [1], [0, 0, 1, 1], [], []>} : vector<2x64xbf16>, vector<64x192xbf16>, vector<2x192xf32> -> vector<2x192xf32>
      %26 = arith.index_cast %arg5 : i32 to index
      %c0_12 = arith.constant 0 : index
      %c0_13 = arith.constant 0 : index
      %27 = vector.load %arg0[%26, %c0_12, %c0_13] : memref<8x2x192xf32, #tpu.memory_space<vmem>>, vector<1x2x192xf32>
      %28 = vector.shape_cast %27 : vector<1x2x192xf32> to vector<2x192xf32>
      %c7_i32 = arith.constant 7 : i32
      %29 = arith.subi %c7_i32, %arg5 : i32
      %30 = arith.index_cast %29 : i32 to index
      %c0_14 = arith.constant 0 : index
      %c0_15 = arith.constant 0 : index
      %31 = vector.load %arg0[%30, %c0_14, %c0_15] : memref<8x2x192xf32, #tpu.memory_space<vmem>>, vector<1x2x192xf32>
      %32 = vector.shape_cast %31 : vector<1x2x192xf32> to vector<2x192xf32>
      %33 = arith.select %20, %28, %32 : vector<2x192xi1>, vector<2x192xf32>
      %34 = vector.extract_strided_slice %33 {offsets = [0, 0], sizes = [2, 64], strides = [1, 1]} : vector<2x192xf32> to vector<2x64xf32>
      %35 = vector.extract_strided_slice %25 {offsets = [0, 0], sizes = [2, 64], strides = [1, 1]} : vector<2x192xf32> to vector<2x64xf32>
      %36 = arith.addf %34, %35 : vector<2x64xf32>
      %37 = arith.negf %36 : vector<2x64xf32>
      %38 = math.exp %37 : vector<2x64xf32>
      %cst_16 = arith.constant 1.000000e+00 : f32
      %39 = vector.broadcast %cst_16 : f32 to vector<2x64xf32>
      %40 = arith.addf %39, %38 : vector<2x64xf32>
      %41 = arith.divf %39, %40 : vector<2x64xf32>
      %42 = vector.extract_strided_slice %33 {offsets = [0, 64], sizes = [2, 64], strides = [1, 1]} : vector<2x192xf32> to vector<2x64xf32>
      %43 = vector.extract_strided_slice %25 {offsets = [0, 64], sizes = [2, 64], strides = [1, 1]} : vector<2x192xf32> to vector<2x64xf32>
      %44 = arith.addf %42, %43 : vector<2x64xf32>
      %45 = arith.negf %44 : vector<2x64xf32>
      %46 = math.exp %45 : vector<2x64xf32>
      %cst_17 = arith.constant 1.000000e+00 : f32
      %47 = vector.broadcast %cst_17 : f32 to vector<2x64xf32>
      %48 = arith.addf %47, %46 : vector<2x64xf32>
      %49 = arith.divf %47, %48 : vector<2x64xf32>
      %50 = vector.extract_strided_slice %33 {offsets = [0, 128], sizes = [2, 64], strides = [1, 1]} : vector<2x192xf32> to vector<2x64xf32>
      %51 = vector.extract_strided_slice %25 {offsets = [0, 128], sizes = [2, 64], strides = [1, 1]} : vector<2x192xf32> to vector<2x64xf32>
      %52 = arith.mulf %41, %51 : vector<2x64xf32>
      %53 = arith.addf %50, %52 : vector<2x64xf32>
      %54 = math.tanh %53 : vector<2x64xf32>
      %cst_18 = arith.constant 1.000000e+00 : f32
      %55 = vector.broadcast %cst_18 : f32 to vector<2x64xf32>
      %56 = arith.subf %55, %49 : vector<2x64xf32>
      %57 = arith.mulf %56, %54 : vector<2x64xf32>
      %58 = arith.mulf %49, %23 : vector<2x64xf32>
      %59 = arith.addf %57, %58 : vector<2x64xf32>
      %c0_19 = arith.constant 0 : index
      %c0_20 = arith.constant 0 : index
      %60 = vector.load %arg4[%c0_19, %c0_20] : memref<2x64xf32, #tpu.memory_space<vmem>>, vector<2x64xf32>
      tpu.vector_store %arg4[%c0_19, %c0_20], %59 {strides = array<i32>} : memref<2x64xf32, #tpu.memory_space<vmem>>, vector<2x64xf32>,
      %61 = vector.extract_strided_slice %59 {offsets = [0, 0], sizes = [2, 32], strides = [1, 1]} : vector<2x64xf32> to vector<2x32xf32>
      %62 = arith.index_cast %arg5 : i32 to index
      %c0_21 = arith.constant 0 : index
      %c0_22 = arith.constant 0 : index
      %63 = vector.load %arg2[%62, %c0_21, %c0_22] : memref<8x2x32xf32, #tpu.memory_space<vmem>>, vector<1x2x32xf32>
      %64 = vector.shape_cast %63 : vector<1x2x32xf32> to vector<2x32xf32>
      %65 = vector.shape_cast %61 : vector<2x32xf32> to vector<1x2x32xf32>
      tpu.vector_store %arg2[%62, %c0_21, %c0_22], %65 {strides = array<i32>} : memref<8x2x32xf32, #tpu.memory_space<vmem>>, vector<1x2x32xf32>,
      %66 = vector.extract_strided_slice %59 {offsets = [0, 32], sizes = [2, 32], strides = [1, 1]} : vector<2x64xf32> to vector<2x32xf32>
      %c7_i32_23 = arith.constant 7 : i32
      %67 = arith.subi %c7_i32_23, %arg5 : i32
      %68 = arith.index_cast %67 : i32 to index
      %c0_24 = arith.constant 0 : index
      %c0_25 = arith.constant 0 : index
      %69 = vector.load %arg3[%68, %c0_24, %c0_25] : memref<8x2x32xf32, #tpu.memory_space<vmem>>, vector<1x2x32xf32>
      %70 = vector.shape_cast %69 : vector<1x2x32xf32> to vector<2x32xf32>
      %71 = vector.shape_cast %66 : vector<2x32xf32> to vector<1x2x32xf32>
      tpu.vector_store %arg3[%68, %c0_24, %c0_25], %71 {strides = array<i32>} : memref<8x2x32xf32, #tpu.memory_space<vmem>>, vector<1x2x32xf32>,
    }
    %c8_i32_8 = arith.constant 8 : i32
    return
  }
}

module attributes {stable_mosaic.version = 11 : i64} {
  func.func @_input_proj_kernel(%arg0: memref<16x64xf32, #tpu.memory_space<vmem>>, %arg1: memref<64x192xbf16, #tpu.memory_space<vmem>>, %arg2: memref<16x192xf32, #tpu.memory_space<vmem>>) attributes {dimension_semantics = [], scalar_prefetch = 0 : i64, scratch_operands = 0 : i64, tpu.core_type = #tpu.core_type<tc>} {
    %c0 = arith.constant 0 : index
    %c0_0 = arith.constant 0 : index
    %0 = vector.load %arg0[%c0, %c0_0] : memref<16x64xf32, #tpu.memory_space<vmem>>, vector<16x64xf32>
    %1 = arith.truncf %0 : vector<16x64xf32> to vector<16x64xbf16>
    %c0_1 = arith.constant 0 : index
    %c0_2 = arith.constant 0 : index
    %2 = vector.load %arg1[%c0_1, %c0_2] : memref<64x192xbf16, #tpu.memory_space<vmem>>, vector<64x192xbf16>
    %cst = arith.constant dense<0.000000e+00> : vector<16x192xf32>
    %3 = tpu.matmul %1, %2, %cst {dimension_numbers = #tpu.dot_dimension_numbers<[1], [0], [0], [1], [0, 0, 1, 1], [], []>} : vector<16x64xbf16>, vector<64x192xbf16>, vector<16x192xf32> -> vector<16x192xf32>
    %c0_3 = arith.constant 0 : index
    %c0_4 = arith.constant 0 : index
    %4 = vector.load %arg2[%c0_3, %c0_4] : memref<16x192xf32, #tpu.memory_space<vmem>>, vector<16x192xf32>
    tpu.vector_store %arg2[%c0_3, %c0_4], %3 {strides = array<i32>} : memref<16x192xf32, #tpu.memory_space<vmem>>, vector<16x192xf32>,
    return
  }
}

module attributes {stable_mosaic.version = 11 : i64} {
  func.func @_linear_ce_kernel(%arg0: i32, %arg1: memref<8x64xf32, #tpu.memory_space<vmem>>, %arg2: memref<64x128xbf16, #tpu.memory_space<vmem>>, %arg3: memref<1x128xf32, #tpu.memory_space<vmem>>, %arg4: memref<8x1xi32, #tpu.memory_space<vmem>>, %arg5: memref<8x1xf32, #tpu.memory_space<vmem>>, %arg6: memref<8x128xf32, #tpu.memory_space<vmem>>, %arg7: memref<1x1xf32, #tpu.memory_space<vmem>>, %arg8: memref<1x1xf32, #tpu.memory_space<vmem>>) attributes {dimension_semantics = [#tpu.dimension_semantics<arbitrary>], iteration_bounds = array<i64: 2>, scalar_prefetch = 0 : i64, scratch_operands = 1 : i64, tpu.core_type = #tpu.core_type<tc>, window_params = [{transform_indices = @transform_0, window_bounds = array<i64: 8, 64>}, {pipeline_mode = #tpu.pipeline_mode<synchronous>, transform_indices = @transform_1, window_bounds = array<i64: 64, 128>}, {pipeline_mode = #tpu.pipeline_mode<synchronous>, transform_indices = @transform_2, window_bounds = array<i64: 1, 128>}, {transform_indices = @transform_3, window_bounds = array<i64: 8, 1>}, {transform_indices = @transform_4, window_bounds = array<i64: 8, 1>}, {transform_indices = @transform_5, window_bounds = array<i64: 8, 128>}, {pipeline_mode = #tpu.pipeline_mode<synchronous>, transform_indices = @transform_6, window_bounds = array<i64: 1, 1>}]} {
    %c0_i32 = arith.constant 0 : i32
    %0 = arith.cmpi eq, %arg0, %c0_i32 : i32
    %1 = arith.extui %0 : i1 to i32
    %c0_i32_0 = arith.constant 0 : i32
    %2 = arith.cmpi ne, %1, %c0_i32_0 : i32
    scf.if %2 {
      %cst_22 = arith.constant 0.000000e+00 : f32
      %42 = vector.broadcast %cst_22 : f32 to vector<1x1xf32>
      %c0_23 = arith.constant 0 : index
      %c0_24 = arith.constant 0 : index
      %43 = vector.load %arg8[%c0_23, %c0_24] : memref<1x1xf32, #tpu.memory_space<vmem>>, vector<1x1xf32>
      tpu.vector_store %arg8[%c0_23, %c0_24], %42 {strides = array<i32>} : memref<1x1xf32, #tpu.memory_space<vmem>>, vector<1x1xf32>,
    } else {
    }
    %c0 = arith.constant 0 : index
    %c0_1 = arith.constant 0 : index
    %3 = vector.load %arg1[%c0, %c0_1] : memref<8x64xf32, #tpu.memory_space<vmem>>, vector<8x64xf32>
    %4 = arith.truncf %3 : vector<8x64xf32> to vector<8x64xbf16>
    %c0_2 = arith.constant 0 : index
    %c0_3 = arith.constant 0 : index
    %5 = vector.load %arg2[%c0_2, %c0_3] : memref<64x128xbf16, #tpu.memory_space<vmem>>, vector<64x128xbf16>
    %cst = arith.constant dense<0.000000e+00> : vector<8x128xf32>
    %6 = tpu.matmul %4, %5, %cst {dimension_numbers = #tpu.dot_dimension_numbers<[1], [0], [0], [1], [0, 0, 1, 1], [], []>} : vector<8x64xbf16>, vector<64x128xbf16>, vector<8x128xf32> -> vector<8x128xf32>
    %c0_4 = arith.constant 0 : index
    %c0_5 = arith.constant 0 : index
    %7 = vector.load %arg3[%c0_4, %c0_5] : memref<1x128xf32, #tpu.memory_space<vmem>>, vector<1x128xf32>
    %8 = vector.broadcast %7 : vector<1x128xf32> to vector<8x128xf32>
    %9 = arith.addf %6, %8 : vector<8x128xf32>
    %c0_6 = arith.constant 0 : index
    %c0_7 = arith.constant 0 : index
    %10 = vector.load %arg6[%c0_6, %c0_7] : memref<8x128xf32, #tpu.memory_space<vmem>>, vector<8x128xf32>
    tpu.vector_store %arg6[%c0_6, %c0_7], %9 {strides = array<i32>} : memref<8x128xf32, #tpu.memory_space<vmem>>, vector<8x128xf32>,
    %cst_8 = arith.constant dense<0xFF800000> : vector<8xf32>
    %11 = vector.multi_reduction <maximumf>, %9, %cst_8 [1] : vector<8x128xf32> to vector<8xf32>
    %12 = vector.shape_cast %11 : vector<8xf32> to vector<8x1xf32>
    %13 = vector.broadcast %12 : vector<8x1xf32> to vector<8x128xf32>
    %14 = arith.subf %9, %13 : vector<8x128xf32>
    %15 = math.exp %14 : vector<8x128xf32>
    %cst_9 = arith.constant dense<0.000000e+00> : vector<8xf32>
    %16 = vector.multi_reduction <add>, %15, %cst_9 [1] : vector<8x128xf32> to vector<8xf32>
    %17 = vector.shape_cast %16 : vector<8xf32> to vector<8x1xf32>
    %18 = math.log %17 : vector<8x1xf32>
    %19 = arith.addf %12, %18 : vector<8x1xf32>
    %20 = tpu.iota {dimensions = array<i32: 1>} : vector<8x128xi32>
    %c0_10 = arith.constant 0 : index
    %c0_11 = arith.constant 0 : index
    %21 = vector.load %arg4[%c0_10, %c0_11] : memref<8x1xi32, #tpu.memory_space<vmem>>, vector<8x1xi32>
    %22 = vector.broadcast %21 : vector<8x1xi32> to vector<8x128xi32>
    %23 = arith.cmpi eq, %20, %22 : vector<8x128xi32>
    %cst_12 = arith.constant 0.000000e+00 : f32
    %24 = vector.broadcast %cst_12 : f32 to vector<8x128xf32>
    %25 = arith.select %23, %9, %24 : vector<8x128xi1>, vector<8x128xf32>
    %cst_13 = arith.constant dense<0.000000e+00> : vector<8xf32>
    %26 = vector.multi_reduction <add>, %25, %cst_13 [1] : vector<8x128xf32> to vector<8xf32>
    %27 = vector.shape_cast %26 : vector<8xf32> to vector<8x1xf32>
    %c0_14 = arith.constant 0 : index
    %c0_15 = arith.constant 0 : index
    %28 = vector.load %arg8[%c0_14, %c0_15] : memref<1x1xf32, #tpu.memory_space<vmem>>, vector<1x1xf32>
    %29 = arith.subf %19, %27 : vector<8x1xf32>
    %c0_16 = arith.constant 0 : index
    %c0_17 = arith.constant 0 : index
    %30 = vector.load %arg5[%c0_16, %c0_17] : memref<8x1xf32, #tpu.memory_space<vmem>>, vector<8x1xf32>
    %31 = arith.mulf %29, %30 : vector<8x1xf32>
    %32 = vector.shape_cast %31 : vector<8x1xf32> to vector<1x8x1xf32>
    %cst_18 = arith.constant dense<0.000000e+00> : vector<1xf32>
    %33 = vector.multi_reduction <add>, %32, %cst_18 [1, 2] : vector<1x8x1xf32> to vector<1xf32>
    %34 = vector.shape_cast %33 : vector<1xf32> to vector<1x1x1xf32>
    %35 = vector.extract %34[0, 0, 0] : f32 from vector<1x1x1xf32>
    %36 = vector.broadcast %35 : f32 to vector<1x1xf32>
    %37 = arith.addf %28, %36 : vector<1x1xf32>
    %c0_19 = arith.constant 0 : index
    %c0_20 = arith.constant 0 : index
    %38 = vector.load %arg8[%c0_19, %c0_20] : memref<1x1xf32, #tpu.memory_space<vmem>>, vector<1x1xf32>
    tpu.vector_store %arg8[%c0_19, %c0_20], %37 {strides = array<i32>} : memref<1x1xf32, #tpu.memory_space<vmem>>, vector<1x1xf32>,
    %c1_i32 = arith.constant 1 : i32
    %39 = arith.cmpi eq, %arg0, %c1_i32 : i32
    %40 = arith.extui %39 : i1 to i32
    %c0_i32_21 = arith.constant 0 : i32
    %41 = arith.cmpi ne, %40, %c0_i32_21 : i32
    scf.if %41 {
      %c0_22 = arith.constant 0 : index
      %c0_23 = arith.constant 0 : index
      %42 = vector.load %arg8[%c0_22, %c0_23] : memref<1x1xf32, #tpu.memory_space<vmem>>, vector<1x1xf32>
      %cst_24 = arith.constant 1.600000e+01 : f32
      %43 = vector.broadcast %cst_24 : f32 to vector<1x1xf32>
      %44 = arith.divf %42, %43 : vector<1x1xf32>
      %c0_25 = arith.constant 0 : index
      %c0_26 = arith.constant 0 : index
      %45 = vector.load %arg7[%c0_25, %c0_26] : memref<1x1xf32, #tpu.memory_space<vmem>>, vector<1x1xf32>
      tpu.vector_store %arg7[%c0_25, %c0_26], %44 {strides = array<i32>} : memref<1x1xf32, #tpu.memory_space<vmem>>, vector<1x1xf32>,
    } else {
    }
    return
  }
  func.func @transform_0(%arg0: i32) -> (i32, i32) {
    %c0_i32 = arith.constant 0 : i32
    %c0_i32_0 = arith.constant 0 : i32
    return %arg0, %c0_i32 : i32, i32
  }
  func.func @transform_1(%arg0: i32) -> (i32, i32) {
    %c0_i32 = arith.constant 0 : i32
    %c0_i32_0 = arith.constant 0 : i32
    %c0_i32_1 = arith.constant 0 : i32
    return %c0_i32, %c0_i32_0 : i32, i32
  }
  func.func @transform_2(%arg0: i32) -> (i32, i32) {
    %c0_i32 = arith.constant 0 : i32
    %c0_i32_0 = arith.constant 0 : i32
    %c0_i32_1 = arith.constant 0 : i32
    return %c0_i32, %c0_i32_0 : i32, i32
  }
  func.func @transform_3(%arg0: i32) -> (i32, i32) {
    %c0_i32 = arith.constant 0 : i32
    %c0_i32_0 = arith.constant 0 : i32
    return %arg0, %c0_i32 : i32, i32
  }
  func.func @transform_4(%arg0: i32) -> (i32, i32) {
    %c0_i32 = arith.constant 0 : i32
    %c0_i32_0 = arith.constant 0 : i32
    return %arg0, %c0_i32 : i32, i32
  }
  func.func @transform_5(%arg0: i32) -> (i32, i32) {
    %c0_i32 = arith.constant 0 : i32
    %c0_i32_0 = arith.constant 0 : i32
    return %arg0, %c0_i32 : i32, i32
  }
  func.func @transform_6(%arg0: i32) -> (i32, i32) {
    %c0_i32 = arith.constant 0 : i32
    %c0_i32_0 = arith.constant 0 : i32
    %c0_i32_1 = arith.constant 0 : i32
    return %c0_i32, %c0_i32_0 : i32, i32
  }
}

</mosaic_0001>

<bundles_post_ra>
// kernel: bidirectional_rnn_gru_forward.7
= control target key start
LH: loop header
LB: loop body
LE: loop exit
PB: predicated region body
PF: predicated region fallthrough
CT: control target
= control target key end

     0   :  { %v140_v1 = vmov 0   ;;  %vm63_vm0 = vcmask 523264   ;;  %s198_s1 = inlined_call_operand.vmem [shape: bf16[64,192], index: 1, kind: input, shape index: {}]   ;;  %s199_s0 = inlined_call_operand.vmem [shape: f32[16,64], index: 0, kind: input, shape index: {}]   ;;  %s200_s2 = inlined_call_operand.vmem [shape: f32[16,192], index: 2, kind: output, shape index: {}]  }
   0x1   :  { %v128_v0 = vld [vmem:[%s198_s1 + $0x34] ss:$8 sps:$4 sm:$0xff]   ;;  %99 = vmatprep.mubr.bf16.mxu0 %v140_v1  ;;  %v130_v2 = vld [vmem:[%s198_s1 + $0x30] ss:$8 sps:$4 sm:$0xff]   ;;  %v131_v3 = vld [vmem:[%s198_s1 + $0x24] ss:$8 sps:$4 sm:$0xff]  }
   0x2   :  { %75 = vmatprep.subr.bf16.mxu0 %v128_v0  ;;  %v133_v4 = vld [vmem:[%s198_s1 + $0x20] ss:$8 sps:$4 sm:$0xff]   ;;  %v134_v5 = vld [vmem:[%s198_s1 + $0x14] ss:$8 sps:$4 sm:$0xff]   ;;  %v136_v6 = vld [vmem:[%s198_s1 + $0x10] ss:$8 sps:$4 sm:$0xff]  }
   0x3   :  { %76 = vmatpush1.bf16.msra.mxu0 %v130_v2  ;;  %v137_v7 = vld [vmem:[%s198_s1 + $0x4] ss:$8 sps:$4 sm:$0xff]   ;;  %v139_v8 = vld [vmem:[%s198_s1] ss:$8 sps:$4 sm:$0xff]  }
   0x4   :  { %77 = vmatprep.subr.bf16.mxu0 %v131_v3  ;;  %v12_v9 = vld [vmem:[%s199_s0] sm:$0xff]  ;;  %v13_v10 = vld [vmem:[%s199_s0 + $0x8] sm:$0xff] }
   0x5   :  { %v14_v11 = vpack.c.bf16 %v13_v10, %v12_v9 }
   0x7   :  { %78 = vmatpush1.bf16.msra.mxu0 %v133_v4 }
   0x8   :  { %79 = vmatprep.subr.bf16.mxu0 %v134_v5 }
   0xb   :  { %80 = vmatpush1.bf16.msra.mxu0 %v136_v6 }
   0xc   :  { %81 = vmatprep.subr.bf16.mxu0 %v137_v7 }
   0xf   :  { %82 = vmatpush1.bf16.msra.mxu0 %v139_v8 }
  0x12   :  { %126 = vmatmul.mubr.msk.bf16.vlgmr.msra.gmra.mxu0 %vm63_vm0, %v14_v11 }
  0xd2   :  { %v101_v12 = vpop.f32.mrf.mxu0 }
  0xd3   :  { %110 = vst [vmem:[%s200_s2] sm:$0xff] %v101_v12 }
  0xd4   :  { %v103_v13 = vpop.f32.mrf.mxu0 }
  0xd5   :  { %111 = vst.msk [vmem:[%s200_s2 + $0x8] sm:$0xff] %vm63_vm0, %v103_v13 }
  0xd6   :  { %v105_v14 = vpop.f32.mrf.mxu0 }
  0xd7   :  { %112 = vst [vmem:[%s200_s2 + $0x10] sm:$0xff] %v105_v14 }
  0xd8   :  { %v107_v15 = vpop.f32.mrf.mxu0 }
  0xd9   :  { %113 = vst.msk [vmem:[%s200_s2 + $0x18] sm:$0xff] %vm63_vm0, %v107_v15 }

// kernel: bidirectional_rnn_gru_forward.5
= control target key start
LH: loop header
LB: loop body
LE: loop exit
PB: predicated region body
PF: predicated region fallthrough
CT: control target
= control target key end

     0   :  { %v90_v1 = vmov 0   ;;  %vm27_vm0 = vcmask 130048   ;;  %vm75_vm1 = vcmask 523264   ;;  %s130_s1 = inlined_call_operand.vmem [shape: bf16[16,192], index: 1, kind: input, shape index: {}]   ;;  %s131_s0 = inlined_call_operand.vmem [shape: f32[16,16], index: 0, kind: input, shape index: {}]   ;;  %s132_s2 = inlined_call_operand.vmem [shape: f32[16,192], index: 2, kind: output, shape index: {}]  }
   0x1   :  { %v87_v0 = vld [vmem:[%s130_s1 + $0x4] ss:$8 sps:$4 sm:$0xff]   ;;  %63 = vmatprep.mubr.bf16.mxu0 %v90_v1  ;;  %v89_v2 = vld [vmem:[%s130_s1] ss:$8 sps:$4 sm:$0xff]  }
   0x2   :  { %v12_v3 = vld [vmem:[%s131_s0] sm:$0xff]  ;;  %v13_v4 = vld [vmem:[%s131_s0 + $0x8] sm:$0xff]  ;;  %45 = vmatprep.subr.bf16.mxu0 %v87_v0 }
   0x3   :  { %v14_v5 = vpack.c.bf16 %v13_v4, %v12_v3  ;;  %46 = vmatpush1.bf16.msra.mxu0 %v89_v2 }
   0x6   :  { %85 = vmatmul.mubr.msk.bf16.vlgmr.msra.gmra.mxu0 %vm27_vm0, %v14_v5 }
  0xc6   :  { %v65_v6 = vpop.f32.mrf.mxu0 }
  0xc7   :  { %74 = vst [vmem:[%s132_s2] sm:$0xff] %v65_v6 }
  0xc8   :  { %v67_v7 = vpop.f32.mrf.mxu0 }
  0xc9   :  { %76 = vst.msk [vmem:[%s132_s2 + $0x8] sm:$0xff] %vm75_vm1, %v67_v7 }
  0xca   :  { %v69_v8 = vpop.f32.mrf.mxu0 }
  0xcb   :  { %77 = vst [vmem:[%s132_s2 + $0x10] sm:$0xff] %v69_v8 }
  0xcc   :  { %v71_v9 = vpop.f32.mrf.mxu0 }
  0xcd   :  { %78 = vst.msk [vmem:[%s132_s2 + $0x18] sm:$0xff] %vm75_vm1, %v71_v9 }

// kernel: bidirectional_rnn_gru_forward.6
= control target key start
LH: loop header
LB: loop body
LE: loop exit
PB: predicated region body
PF: predicated region fallthrough
CT: control target
= control target key end

     0   :  { %vm14_vm0 = vcmask 517120   ;;  %v16_v0 = vlaneseq  ;;  %v279_v1 = vmov 0.0   ;;  %s352_s28 = smov 0   ;;  %s400_s0 = inlined_call_operand.vmem [shape: f32[8,2,192], index: 0, kind: input, shape index: {}]   ;;  %s401_s1 = inlined_call_operand.vmem [shape: bf16[64,192], index: 1, kind: input, shape index: {}]   ;;  %s402_s2 = inlined_call_operand.vmem [shape: f32[8,2,32], index: 2, kind: output, shape index: {0}]   ;;  %s403_s3 = inlined_call_operand.vmem [shape: f32[8,2,32], index: 3, kind: output, shape index: {1}]  }
   0x1   :  { %15 = vst.msk [vmem:[#allocation2] sm:$0x3] %vm14_vm0, %v279_v1  ;;  %v307_v2 = vld [vmem:[%s401_s1] sm:$0xff]  ;;  %v312_v3 = vld [vmem:[%s401_s1 + $0x8] sm:$0xff]  ;;  %v317_v4 = vld [vmem:[%s401_s1 + $0x10] sm:$0xff] }
   0x2   :  { %v17_v5 = vand.u32 127, %v16_v0  ;;  %v322_v6 = vld [vmem:[%s401_s1 + $0x18] sm:$0xff]  ;;  %v327_v7 = vld [vmem:[%s401_s1 + $0x20] sm:$0xff]  ;;  %v332_v8 = vld [vmem:[%s401_s1 + $0x28] sm:$0xff] }
   0x3   :  { %v337_v9 = vld [vmem:[%s401_s1 + $0x30] sm:$0xff]  ;;  %v342_v10 = vld [vmem:[%s401_s1 + $0x38] sm:$0xff] }
   0x4   :  { %v18_v11 = vadd.s32 128, %v17_v5  ;;  %v23_v12 = vand.u32 63, %v17_v5 }
   0x6   :  { %v30_v13 = vand.u32 63, %v18_v11  ;;  %vm344_vm1 = vcmp.lt.s32.totalorder %v23_v12, 32 }
   0x8   :  { %vm348_vm2 = vcmp.lt.s32.totalorder %v30_v13, 32 }
   0x9 LB: > { %v242_v16 = vcombine.high %v337_v9, %v342_v10  ;;  %v241_v17 = vcombine.low %v337_v9, %v342_v10  ;;  %v240_v18 = vcombine.high %v327_v7, %v332_v8  ;;  %v239_v19 = vcombine.low %v327_v7, %v332_v8  ;;  %v59_v25 = vld [vmem:[#allocation2] sm:$0x3]  ;;  %s150_s1 = ssub.s32 7, %s277_s28  ;;  %s251_s29 = sshll.u32 %s277_s28, 2  ;;  %s277_s28 = sphi %s352_s28, %s58_s28  }
   0xa   : > { %v280_v20 = vmov 0   ;;  %v238_v21 = vcombine.high %v317_v4, %v322_v6  ;;  %v237_v22 = vcombine.low %v317_v4, %v322_v6  ;;  %v236_v23 = vcombine.high %v307_v2, %v312_v3  ;;  %s252_s30 = sshll.u32 %s150_s1, 2  ;;  %s148_s6 = scalar_lea.vmem %s400_s0, %s251_s29 }
   0xb   : > { %113 = vmatprep.subr.bf16.mxu0 %v242_v16  ;;  %137 = vmatprep.mubr.bf16.mxu0 %v280_v20  ;;  %v235_v24 = vcombine.low %v307_v2, %v312_v3  ;;  %v60_v26 = vpack.c.bf16 %v59_v25, %v59_v25  ;;  %vm101_vm3 = vcmask 523264   ;;  %s153_s9 = scalar_lea.vmem %s400_s0, %s252_s30  ;;  %v248_v27 = vld.sshfl [vmem:[%s148_s6] sm:$0x33 pattern:$0x76325410]  ;;  %s281_s10 = smov 64  }
   0xc   : > { %114 = vmatpush1.bf16.msra.mxu0 %v241_v17  ;;  %v249_v28 = vld.sshfl [vmem:[%s153_s9] sm:$0x33 pattern:$0x76325410]  ;;  %v163_v38 = vcombine.high %v248_v27, %v248_v27  ;;  %s282_s11 = smov 32   ;;  %s244_s12 = sshll.u32 %s277_s28, 1 }
   0xd   : > { %115 = vmatprep.subr.bf16.mxu0 %v240_v18  ;;  %v177_v29 = vsel %vm344_vm1, %v248_v27, %v249_v28  ;;  %v174_v39 = vcombine.high %v249_v28, %v249_v28  ;;  %vm207_vm4 = vcmask 254976   ;;  %s206_s15 = scalar_lea.vmem %s402_s2, %s244_s12  ;;  %s246_s16 = sshll.u32 %s150_s1, 1 }
   0xe   : > { %s212_s19 = scalar_lea.vmem %s403_s3, %s246_s16  ;;  %s58_s28 = sadd.s32 1, %s277_s28  }
   0xf   : > { %v178_v41 = vsel %vm348_vm2, %v163_v38, %v174_v39  ;;  %p55_p0 = scmp.ge.s32.totalorder %s58_s28, 8  }
  0x10   : > { %116 = vmatpush1.bf16.msra.mxu0 %v239_v19 }
  0x11   : > { %117 = vmatprep.subr.bf16.mxu0 %v238_v21 }
  0x14   : > { %118 = vmatpush1.bf16.msra.mxu0 %v237_v22 }
  0x15   : > { %119 = vmatprep.subr.bf16.mxu0 %v236_v23 }
  0x18   : > { %120 = vmatpush1.bf16.msra.mxu0 %v235_v24 }
  0x1b   : > { %243 = vmatmul.mubr.msk.bf16.vlgmr.msra.gmra.mxu0 %vm101_vm3, %v60_v26 }
  0xdb   : > { %v139_v30 = vpop.f32.mrf.mxu0 }
  0xdc   : > { %v179_v31 = vadd.f32 %v177_v29, %v139_v30 }
  0xdd   : > { %v141_v32 = vpop.f32.mrf.mxu0 }
  0xde   : > { %v250_v33 = vmul.f32 -1.442695, %v179_v31 }
  0xdf   : > { %v143_v34 = vpop.f32.mrf.mxu0 }
  0xe0   : > { %265 = vpow2.f32 %v250_v33 }
  0xe1   : > { %v144_v35 = vpop.f32.mrf.mxu0 }
  0xed   : > { %v266_v36 = vpop.eup %265 }
  0xee   : > { %v183_v37 = vadd.f32 1.0, %v266_v36 }
  0xf0   : > { %267 = vrcp.f32 %v183_v37 }
  0xfd   : > { %v268_v40 = vpop.eup %267 }
  0xfe   : > { %v186_v42 = vmul.f32 %v268_v40, %v141_v32  ;;  %v189_v46 = vsub.f32 1.0, %v268_v40 }
 0x100   : > { %v187_v43 = vadd.f32 %v186_v42, %v178_v41 }
 0x102   : > { %269 = vtanh.f32 %v187_v43 }
 0x10f   : > { %v270_v44 = vpop.eup %269 }
 0x110   : > { %191 = vrot.lane.b32.xlu0 %v270_v44, %s281_s10 }
 0x114   : > { %196 = vrot.lane.b32.xlu0 %v59_v25, %s281_s10 }
 0x182   : > { %v192_v45 = vpop.permute.xlu0 %191 }
 0x183   : > { %v194_v48 = vmul.f32 %v192_v45, %v189_v46 }
 0x186   : > { %v197_v47 = vpop.permute.xlu0 %196 }
 0x187   : > { %v199_v49 = vmul.f32 %v268_v40, %v197_v47 }
 0x189   : > { %v200_v50 = vadd.f32 %v199_v49, %v194_v48 }
 0x18b   : > { %202 = vrot.lane.b32.xlu1 %v200_v50, %s281_s10 }
 0x18f   : > { %209 = vrot.lane.b32.xlu1 %v200_v50, %s282_s11 }
 0x1fd   : > { %v203_v51 = vpop.permute.xlu1 %202 }
 0x1fe   : > { %205 = vst.msk [vmem:[#allocation2] sm:$0x3] %vm14_vm0, %v203_v51 }
 0x1ff   : > { %208 = vst.msk [vmem:[%s206_s15] sm:$0x3] %vm207_vm4, %v203_v51 }
 0x201   : > { %v210_v52 = vpop.permute.xlu1 %209 }
 0x202   : > { %213 = vst.msk [vmem:[%s212_s19] sm:$0x3] %vm207_vm4, %v210_v52 }
 0x203   :  { %57 = sbr.rel (!%p55_p0) target bundleno = 9 (0x9), region = 47 }

// kernel: bidirectional_rnn_gru_forward.9
= control target key start
LH: loop header
LB: loop body
LE: loop exit
PB: predicated region body
PF: predicated region fallthrough
CT: control target
= control target key end

     0   :  { %12 = vsyncpa [#allocation4], 0  ;;  %s919_s0 = inlined_call_operand.vmem [shape: f32[16,64], index: 0, kind: input, shape index: {}]   ;;  %s920_s1 = inlined_call_operand.vmem [shape: bf16[64,128], index: 1, kind: input, shape index: {}]   ;;  %s921_s2 = inlined_call_operand.vmem [shape: f32[1,128], index: 2, kind: input, shape index: {}]   ;;  %s922_s3 = inlined_call_operand.vmem [shape: s32[16,1], index: 3, kind: input, shape index: {}]   ;;  %s923_s4 = inlined_call_operand.vmem [shape: f32[16,1], index: 4, kind: input, shape index: {}]   ;;  %s924_s5 = inlined_call_operand.hbm [shape: f32[16,128], index: 5, kind: output, shape index: {0}]   ;;  %s925_s6 = inlined_call_operand.hbm [shape: f32[1,1], index: 6, kind: output, shape index: {1}]  }
   0x1   :  { %14 = vsyncpa [#allocation4 + $0x1], 0 }
   0x2   :  { %15 = vsyncpa [#allocation6], 0  ;;  %s770_s21 = smov 0   ;;  %s772_s22 = smov 0  }
   0x3   :  { %s774_s23 = smov 0   ;;  %s776_s24 = smov 0  }
   0x4 LB: > { %s791_s25 = sadd.s32 4294967295, %s727_s24   ;;  %s539_s26 = sadd.s32 4294967294, %s727_s24   ;;  %s727_s24 = sphi %s776_s24, %s937_s24   ;;  %s723_s23 = sphi %s774_s23, %s936_s23   ;;  %s719_s22 = sphi %s772_s22, %s935_s22   ;;  %s715_s21 = sphi %s770_s21, %s934_s21  }
   0x5   : > { %s795_s27 = sadd.s32 1, %s727_s24   ;;  %s148_s28 = sadd.s32 1, %s723_s23 }
   0x6   : > { %s145_s29 = ssub.s32 %s727_s24, %s795_s27  ;;  %p158_p0 = scmp.ne.s32.totalorder %s723_s23, %s719_s22 }
   0x7   : > { %p146_p1 = scmp.eq.s32.totalorder %s145_s29, 0  ;;  %p926_p2 = scmp.eq.s32.totalorder %s791_s25, 1 }
   0x8   : > { %p164_p3 = scmp.ne.s32.totalorder %s719_s22, %s715_s21  ;;  %p165_p4 = scmp.eq.s32.totalorder %s539_s26, 1 }
   0x9   : > { %s806_s30 = scalar_select %p146_p1, %s723_s23, %s148_s28  }
   0xa   : > { %p810_p5 = por %p926_p2, %p158_p0  ;;  %p814_p6 = por %p165_p4, %p164_p3 }
   0xb   : > { %p542_p7 = scmp.ge.s32.totalorder %s727_s24, 1  ;;  %p231_p8 = scmp.lt.s32.totalorder %s727_s24, 3 }
   0xc   : > { %s928_s8 = scalar_select %p814_p6, 1, 0 }
   0xd   : > { %p232_p9 = pnand %p542_p7, %p231_p8 }
   0xe   : > { %s263_s9 = sand.u32 (!%p232_p9), 1, %s719_s22   ;;  %p268_p10 = scmp.lt.s32.totalorder (!%p232_p9), %s791_s25, 1 }
   0xf   : > { %235 = sbr.rel (%p232_p9) target bundleno = 813 (0x32d), region = 40  ;;  %s824_s10 = sshll.u32 (!%p232_p9), %s263_s9, 3 }
  0x10   : > { %s265_s28 = scalar_lea.vmem (!%p232_p9), [#allocation3], %s824_s10  ;;  %p547_p11 = scmp.ne.s32.totalorder (!%p232_p9), %s791_s25, 0 }
  0x14   : > { %s269_s11 = scalar_select %p268_p10, %s791_s25, 1 }
  0x15   : > { %284 = sbr.rel (%p547_p11) target bundleno = 28 (0x1c), region = 44 }
  0x16   : > { %s827_s12 = sshll.u32 %s269_s11, 3 }
  0x17   : > { %s271_s15 = scalar_lea.vmem %s919_s0, %s827_s12  ;;  %s275_s18 = scalar_lea.vmem %s922_s3, %s827_s12 }
  0x18   : > { %s279_s26 = scalar_lea.vmem %s923_s4, %s827_s12 }
  0x1a   : > { %vm285_vm0 = vcmask 0   ;;  %v729_v0 = vmov 0.0  }
  0x1b   : > { %286 = vst.msk [vmem:[#allocation2] sm:$0x1] %vm285_vm0, %v729_v0 }
  0x1c PF: > { %v631_v1 = vld [vmem:[%s920_s1 + $0x18] sm:$0xff]   ;;  %v730_v2 = vmov 0.0   ;;  %v632_v3 = vld [vmem:[%s920_s1 + $0x10] sm:$0xff]   ;;  %vm731_vm1 = vmmov 0   ;;  %v633_v4 = vld [vmem:[%s920_s1 + $0x8] sm:$0xff]   ;;  %vm328_vm2 = vcmask 523264   ;;  %v383_v19 = vlaneseq }
  0x1d   : > { %566 = vmatprep.subr.bf16.mxu0 %v730_v2  ;;  %574 = vmatprep.mubr.msk.bf16.mxu0 %vm731_vm1, %v730_v2  ;;  %v634_v5 = vld [vmem:[%s920_s1] sm:$0xff]   ;;  %v732_v8 = vmov 0   ;;  %vm397_vm4 = vcmask 7168   ;;  %vm410_vm5 = vcmask 0   ;;  %p554_p12 = scmp.ne.s32.totalorder %s791_s25, 1 }
  0x1e   : > { %567 = vmatpush3.bf16.msra.mxu0 %v631_v1  ;;  %v287_v6 = vld [vmem:[%s271_s15] sm:$0xff]  ;;  %630 = vset.pattern.permute.xlu0 %v732_v8  ;;  %v384_v20 = vand.u32 127, %v383_v19 }
  0x1f   : > { %568 = vmatprep.subr.bf16.mxu0 %v730_v2  ;;  %v288_v7 = vpack.c.bf16 %v287_v6, %v287_v6  ;;  %v548_v9 = vld [vmem:[%s921_s2] ss:$0 sm:$0xff] }
  0x20   : > { %v385_v15 = vld [vmem:[%s275_s18] sm:$0xff] }
  0x21   : > { %v395_v29 = vld [vmem:[%s279_s26] sm:$0xff] }
  0x22   : > { %569 = vmatpush3.bf16.msra.mxu0 %v632_v3  ;;  %v393_v40 = vld [vmem:[#allocation2] sm:$0x1] }
  0x23   : > { %570 = vmatprep.subr.bf16.mxu0 %v730_v2 }
  0x26   : > { %571 = vmatpush3.bf16.msra.mxu0 %v633_v4 }
  0x27   : > { %572 = vmatprep.subr.bf16.mxu0 %v730_v2 }
  0x2a   : > { %573 = vmatpush3.bf16.msra.mxu0 %v634_v5 }
  0x2d   : > { %575 = vmatmul.mubr.msk.bf16.vlgmr.msra.gmra.mxu0 %vm328_vm2, %v288_v7 }
  0xed   : > { %v366_v10 = vpop.f32.mrf.mxu0 }
  0xee   : > { %v367_v11 = vadd.f32 %v548_v9, %v366_v10 }
  0xef   : > { %v576_v12 = vpop.f32.mrf.mxu0 }
  0xf0   : > { %372 = vst [vmem:[%s265_s28] sm:$0xff] %v367_v11  ;;  %373 = vmax.xlane.f32.xlu0 %v367_v11 }
  0xf1   : > { %v369_v13 = vpop.f32.mrf.mxu0 }
  0xf3   : > { %v577_v14 = vpop.f32.mrf.mxu0 }
 0x106   : > { %387 = vperm.xlu0 %630, %v385_v15  }
 0x179   : > { %v374_v16 = vpop.xlane.xlu0 %373 }
 0x17a   : > { %v375_v17 = vsub.f32 %v367_v11, %v374_v16 }
 0x17c   : > { %v376_v18 = vmul.f32 1.442695, %v375_v17 }
 0x17e   : > { %635 = vpow2.f32 %v376_v18 }
 0x181   : > { %v388_v21 = vpop.permute.xlu0 %387 }
 0x182   : > { %vm389_vm3 = vcmp.eq.s32.totalorder %v384_v20, %v388_v21 }
 0x183   : > { %v390_v23 = vsel %vm389_vm3, %v367_v11, 0.0 }
 0x18b   : > { %v636_v22 = vpop.eup %635 }
 0x18c   : > { %378 = vadd.xlane.f32.xlu1 %v636_v22 }
 0x190   : > { %391 = vadd.xlane.f32.xlu1 %v390_v23 }
 0x215   : > { %v379_v24 = vpop.xlane.xlu1 %378 }
 0x216   : > { %637 = vlog2.f32 %v379_v24 }
 0x219   : > { %v392_v28 = vpop.xlane.xlu1 %391 }
 0x223   : > { %v638_v25 = vpop.eup %637 }
 0x224   : > { %v381_v26 = vmul.f32 0.6931472, %v638_v25 }
 0x226   : > { %v382_v27 = vadd.f32 %v381_v26, %v374_v16 }
 0x228   : > { %v394_v30 = vsub.f32 %v382_v27, %v392_v28 }
 0x22a   : > { %v396_v31 = vmul.f32 %v395_v29, %v394_v30 }
 0x22c   : > { %v398_v32 = vsel %vm397_vm4, %v396_v31, 0.0 }
 0x22d   : > { %399 = vadd.xlane.f32.xlu1 %v398_v32 }
 0x2b6   : > { %v400_v33 = vpop.xlane.xlu1 %399 }
 0x2b7   : > { %v401_v34 = vrot.slane %v400_v33, 4 }
 0x2b9   : > { %v402_v35 = vadd.f32 %v401_v34, %v400_v33 }
 0x2bb   : > { %v403_v36 = vrot.slane %v402_v35, 2 }
 0x2bd   : > { %v404_v37 = vadd.f32 %v403_v36, %v402_v35 }
 0x2bf   : > { %v405_v38 = vrot.slane %v404_v37, 1 }
 0x2c1   : > { %v406_v39 = vadd.f32 %v405_v38, %v404_v37 }
 0x2c3   : > { %578 = vpush %v406_v39 }
 0x2f4   : > { %s579_s16 = spop %578  ;;  %415 = sbr.rel (%p554_p12) target bundleno = 771 (0x303), region = 48 }
 0x2f5   : > { %v408_v41 = vstv %s579_s16 }
 0x2f6   : > { %v409_v42 = vadd.f32 %v408_v41, %v393_v40 }
 0x2f8   : > { %411 = vst.msk [vmem:[#allocation2] sm:$0x1] %vm410_vm5, %v409_v42 }
 0x2ff   : > { %v416_v43 = vld [vmem:[#allocation2] sm:$0x1] }
 0x300   : > { %v418_v44 = vmul.f32 0.0625, %v416_v43 }
 0x302   : > { %419 = vst.msk [vmem:[#allocation5] sm:$0x1] %vm410_vm5, %v418_v44 }
 0x303 PF: > { %s556_s12 = sshll.u32 %s791_s25, 7  ;;  %s434_s20 = sshll.u32 %s265_s28, 4  ;;  %s435_s20 = int_to_ptr.vmem [resolvable:$true] %s434_s20 }
 0x304   : > { %s432_s19 = scalar_lea.hbm %s924_s5, %s556_s12  ;;  %s421_s29 = scalar_lea.sflag [#allocation4], %s263_s9 }
 0x305   : > { %s639_s11 = scalar_lea.vmem %s435_s20, 128  ;;  %s733_s15 = smov [#allocation3]  }
 0x306   : > { %p640_p13 = scmp.ne.s32.totalorder %s435_s20, %s639_s11  ;;  %s643_s13 = sshll.u32 %s733_s15, 4  ;;  %s644_s13 = int_to_ptr.vmem [resolvable:$false] %s643_s13 }
 0x307   : > { %s645_s18 = scalar_lea.vmem %s644_s13, 256  ;;  %p646_p3 = scmp.lt.s32.totalorder %s435_s20, %s644_s13 }
 0x308   : > { %p641_p0 = pnand %p640_p13, %p810_p5  ;;  %p647_p4 = scmp.lt.s32.totalorder %s645_s18, %s639_s11 }
 0x30a   : > { %p642_p1 = pneg %p641_p0  ;;  %p648_p7 = por %p647_p4, %p646_p3 }
 0x30c   : > { %p649_p8 = pnand %p648_p7, %p642_p1 }
 0x30e   : > { %652 = shalt.err (!%p649_p8)
}
 0x30f   : > { %s653_s14 = scalar_lea.hbm %s432_s19, 128  ;;  %s657_s28 = scalar_lea.hbm %s924_s5, 256 }
 0x310   : > { %p654_p9 = scmp.ne.s32.totalorder %s432_s19, %s653_s14  ;;  %p658_p12 = scmp.lt.s32.totalorder %s432_s19, %s924_s5 }
 0x311   : > { %p659_p13 = scmp.lt.s32.totalorder %s657_s28, %s653_s14 }
 0x312   : > { %p655_p10 = pnand %p654_p9, %p810_p5 }
 0x313   : > { %p660_p0 = por %p659_p13, %p658_p12 }
 0x314   : > { %p656_p11 = pneg %p655_p10 }
 0x316   : > { %p661_p2 = pnand %p660_p0, %p656_p11 }
 0x318   : > { %664 = shalt.err (!%p661_p2)
}
 0x319   : > { %580 = dma.vmem_to_hbm [thread:$0]  (%p810_p5), %s435_s20, 128, %s432_s19, %s421_s29  }
 0x31a   : > { %s734_s26 = smov [#allocation5]   ;;  %p929_p3 = scmp.eq.s32.totalorder %s791_s25, 1 }
 0x31b   : > { %s445_s17 = sshll.u32 %s734_s26, 4  ;;  %s446_s17 = int_to_ptr.vmem [resolvable:$true] %s445_s17 }
 0x31c   : > { %s665_s11 = scalar_lea.vmem %s446_s17, 16  ;;  %s671_s15 = scalar_lea.vmem %s446_s17, 32 }
 0x31d   : > { %p666_p1 = scmp.ne.s32.totalorder %s446_s17, %s665_s11  ;;  %p672_p8 = scmp.lt.s32.totalorder %s446_s17, %s446_s17 }
 0x31e   : > { %p673_p9 = scmp.lt.s32.totalorder %s671_s15, %s665_s11 }
 0x31f   : > { %p667_p4 = pnand %p666_p1, %p929_p3 }
 0x320   : > { %p674_p10 = por %p673_p9, %p672_p8 }
 0x321   : > { %p668_p7 = pneg %p667_p4 }
 0x323   : > { %p675_p6 = pnand %p674_p10, %p668_p7 }
 0x325   : > { %678 = shalt.err (!%p675_p6)
}
 0x326   : > { %p930_p2 = pmov %p929_p3 }
 0x328   : > { %582 = dma.vmem_to_hbm [thread:$0]  (%p930_p2), %s446_s17, 16, %s925_s6, [#allocation6]  }
 0x329   : > { %p931_p5 = pmov %p930_p2 }
 0x32a   : > { %p932_p11 = pmov %p930_p2 }
 0x32b   : > { %706 = dma.done.wait (%p931_p5), [#allocation6], 16  }
 0x32c   : > { %708 = vsyncadd (%p932_p11), [#allocation6], 4294967280 }
 0x32d PF: > { %p592_p12 = scmp.ge.s32.totalorder %s727_s24, 2  ;;  %s461_s19 = sand.u32 1, %s715_s21  }
 0x32e   : > { %p933_p13 = scmp.ne.s32.totalorder %s928_s8, 0  ;;  %s462_s20 = scalar_lea.sflag [#allocation4], %s461_s19 }
 0x330   : > { %p587_p6 = pnand %p592_p12, %p933_p13 }
 0x332   : > { %p588_p0 = pneg %p587_p6 }
 0x334   : > { %710 = dma.done.wait (%p588_p0), %s462_s20, 128  }
 0x335   : > { %712 = vsyncadd (%p588_p0), %s462_s20, 4294967168  ;;  %p18_p1 = scmp.ge.s32.totalorder %s795_s27, 4   ;;  %s934_s21 = smov %s719_s22 }
 0x336   : > { %s935_s22 = smov %s723_s23  ;;  %s936_s23 = smov %s806_s30 }
 0x337   : > { %s937_s24 = smov %s795_s27  ;;  %20 = sbr.rel (!%p18_p1) target bundleno = 4 (0x4), region = 97 }
 0x33c   :  { %467 = vsyncpa [#allocation4], 1 }
 0x33d   :  { %469 = vsyncpa [#allocation4 + $0x1], 1 }
 0x33e   :  { %470 = vsyncpa [#allocation6], 1 }

</bundles_post_ra>
